<compile_context>
chip_gen: v5e
topology: v5e:2x2
jax: 0.10.0
libtpu: 0.0.40
codegen_flags: <defaults>
</compile_context>

<pallas_src>
import jax
import jax.numpy as jnp
from jax import lax
from jax.experimental import pallas as pl
from jax.experimental.pallas import tpu as pltpu

N_CRIT = 2                    # (1.0, MSE) and (0.5, L1)
LANES = 128
CHUNK_ROWS = 64               # 64x128 f32 = 8 vregs per loaded chunk
TILE_ROWS_MAX = 8192          # 8192x128 f32 = 4 MiB; 3 arrays -> 12 MiB/step
SMALL_PROBLEM_ELEMS = 1 << 16 # below this, plain JAX beats a pallas_call


def _round_up(x, m):
    return ((x + m - 1) // m) * m


def _make_kernel(tile_rows, chunk_rows, valid_rows, need_mask):
    """Build the per-block partial-sum kernel with static tiling parameters."""
    n_full = tile_rows // chunk_rows
    rem = tile_rows - n_full * chunk_rows

    def kernel(yhat_ref, y_ref, out_ref):
        # yhat_ref: VMEM (N_CRIT, tile_rows, 128) stacked predictions
        # y_ref:    VMEM (tile_rows, 128)         shared target tile
        # out_ref:  VMEM (1, N_CRIT, 128)         lane-wise partial sums
        if need_mask:
            block_row0 = pl.program_id(0) * tile_rows
            # Valid rows in this block; exceeds tile_rows for non-last blocks,
            # in which case the comparison below selects everything.
            valid_in_block = valid_rows - block_row0

        def chunk_contrib(off, nrows):
            y = y_ref[pl.ds(off, nrows), :].astype(jnp.float32)
            d0 = yhat_ref[0, pl.ds(off, nrows), :].astype(jnp.float32) - y
            d1 = yhat_ref[1, pl.ds(off, nrows), :].astype(jnp.float32) - y
            sq = d0 * d0                     # MSE contribution
            ab = jnp.abs(d1)                 # L1 contribution
            if need_mask:
                rid = lax.broadcasted_iota(jnp.int32, (nrows, LANES), 0) + off
                m = rid < valid_in_block
                sq = jnp.where(m, sq, 0.0)
                ab = jnp.where(m, ab, 0.0)
            return sq, ab

        p0 = jnp.zeros((1, LANES), jnp.float32)
        p1 = jnp.zeros((1, LANES), jnp.float32)

        if n_full > 0:
            def body(c, carry):
                acc0, acc1 = carry
                off = pl.multiple_of(c * chunk_rows, chunk_rows)
                sq, ab = chunk_contrib(off, chunk_rows)
                return acc0 + sq, acc1 + ab

            acc0 = jnp.zeros((chunk_rows, LANES), jnp.float32)
            acc1 = jnp.zeros((chunk_rows, LANES), jnp.float32)
            acc0, acc1 = lax.fori_loop(0, n_full, body, (acc0, acc1))
            p0 = p0 + jnp.sum(acc0, axis=0, keepdims=True)
            p1 = p1 + jnp.sum(acc1, axis=0, keepdims=True)

        if rem > 0:
            sq, ab = chunk_contrib(n_full * chunk_rows, rem)
            p0 = p0 + jnp.sum(sq, axis=0, keepdims=True)
            p1 = p1 + jnp.sum(ab, axis=0, keepdims=True)

        # Direct indexed stores (no sublane concatenate).
        out_ref[0, 0:1, :] = p0
        out_ref[0, 1:2, :] = p1

    return kernel


def _plain_jax_loss(y_hat_stacked, y, weights, reduction):
    y = y.astype(jnp.float32)
    l0 = (y_hat_stacked[0].astype(jnp.float32) - y) ** 2
    l1 = jnp.abs(y_hat_stacked[1].astype(jnp.float32) - y)
    per_sample = jnp.stack(
        [l0.sum(axis=1) * weights[0], l1.sum(axis=1) * weights[1]], axis=1)
    if reduction == "sum":
        return per_sample.sum()
    if reduction == "mean":
        return per_sample.mean(axis=0).sum()
    return per_sample.sum(axis=1)          # 'none': per-sample weighted loss


def multi_objective_loss(y_hat_stacked, y, weights, reduction="mean",
                         use_pallas=None):
    """y_hat_stacked: (N_CRIT, B, D); y: (B, D); weights: (N_CRIT,)."""
    n_crit, b, d = y_hat_stacked.shape
    assert n_crit == N_CRIT and y.shape == (b, d)
    if reduction not in ("mean", "sum", "none"):
        raise ValueError(f"unsupported reduction: {reduction!r}")
    weights = jnp.asarray(weights, jnp.float32)
    total = b * d

    if reduction == "none":
        # TODO(synk): per-sample ('none') reduction needs a row-aligned (B, D)
        # Pallas tiling; served by the plain-JAX path for now.
        return _plain_jax_loss(y_hat_stacked, y, weights, reduction)

    if use_pallas is None:
        use_pallas = total >= SMALL_PROBLEM_ELEMS
    if not use_pallas:
        return _plain_jax_loss(y_hat_stacked, y, weights, reduction)

    # ---- lane-dense flattening ------------------------------------------
    yh = y_hat_stacked.reshape(n_crit, total)
    yv = y.reshape(total)
    lane_pad = _round_up(total, LANES) - total
    if lane_pad:
        # Only the sub-128 remainder of the last lane-row is padded; zeros
        # contribute 0 to both the squared and the absolute sums.
        yh = jnp.pad(yh, ((0, 0), (0, lane_pad)))
        yv = jnp.pad(yv, (0, lane_pad))
    rows = (total + lane_pad) // LANES
    yh = yh.reshape(n_crit, rows, LANES)
    yv = yv.reshape(rows, LANES)

    # ---- tile selection ---------------------------------------------------
    if rows <= 2 * CHUNK_ROWS:
        tile_rows = rows                       # single full-extent block
    else:
        # Multiple of CHUNK_ROWS, >= 2 grid steps (v7x has 2 TensorCores),
        # capped so a double-buffered step stays well under v7x's 64 MiB VMEM.
        tile_rows = min(TILE_ROWS_MAX, _round_up(pl.cdiv(rows, 2), CHUNK_ROWS))
    grid = pl.cdiv(rows, tile_rows)
    chunk_rows = min(CHUNK_ROWS, tile_rows)
    need_mask = grid * tile_rows != rows       # ragged last block -> mask it

    kernel = _make_kernel(tile_rows, chunk_rows, rows, need_mask)

    bytes_per_step = (n_crit * tile_rows * LANES * yh.dtype.itemsize
                      + tile_rows * LANES * yv.dtype.itemsize)
    vmem_limit = int(min(48 << 20, max(32 << 20, 2 * bytes_per_step + (2 << 20))))

    partials = pl.pallas_call(
        kernel,
        out_shape=jax.ShapeDtypeStruct((grid, N_CRIT, LANES), jnp.float32),
        grid_spec=pltpu.PrefetchScalarGridSpec(
            num_scalar_prefetch=0,
            grid=(grid,),
            in_specs=[
                pl.BlockSpec((N_CRIT, tile_rows, LANES), lambda i: (0, i, 0)),
                pl.BlockSpec((tile_rows, LANES), lambda i: (i, 0)),
            ],
            out_specs=pl.BlockSpec((1, N_CRIT, LANES), lambda i: (i, 0, 0)),
        ),
        compiler_params=pltpu.CompilerParams(
            dimension_semantics=("parallel",),     # v7x: both TCs stream HBM
            vmem_limit_bytes=vmem_limit,
        ),
    )(yh, yv)

    crit_sums = jnp.sum(partials, axis=(0, 2))         # (N_CRIT,)
    weighted = crit_sums * weights
    if reduction == "sum":
        return jnp.sum(weighted)
    # 'mean': mean over the ORIGINAL batch size.
    return jnp.sum(weighted) / jnp.float32(b)


def reference_loss(y_hat_stacked, y, weights, reduction="mean"):
    # Pure-JAX mirror of the PyTorch forward.
    l0 = (y_hat_stacked[0].astype(jnp.float32) - y.astype(jnp.float32)) ** 2
    l1 = jnp.abs(y_hat_stacked[1].astype(jnp.float32) - y.astype(jnp.float32))
    s0 = l0.sum(axis=1) * weights[0]
    s1 = l1.sum(axis=1) * weights[1]
    if reduction == "sum":
        return s0.sum() + s1.sum()
    return s0.mean() + s1.mean()


if __name__ == "__main__":
    key = jax.random.PRNGKey(0)
    weights = jnp.array([1.0, 0.5], dtype=jnp.float32)  # module "parameters"

    # 1) Small demo shape from the module (single block, grid=1).
    B, D = 8, 32
    k1, k2, key = jax.random.split(key, 3)
    y_hat = jax.random.normal(k1, (N_CRIT, B, D), dtype=jnp.float32)
    y = jax.random.normal(k2, (B, D), dtype=jnp.float32)
    out = jax.block_until_ready(
        multi_objective_loss(y_hat, y, weights, use_pallas=True))
    ref = jax.block_until_ready(reference_loss(y_hat, y, weights))
    assert out.shape == (), f"expected scalar, got {out.shape}"
    assert jnp.allclose(out, ref, rtol=1e-4, atol=1e-4), (out, ref)
    # fast-path (plain JAX) agrees as well
    out_fast = jax.block_until_ready(multi_objective_loss(y_hat, y, weights))
    assert jnp.allclose(out_fast, ref, rtol=1e-4, atol=1e-4), (out_fast, ref)

    # 2) Multi-block grid with a ragged (masked) last block, reduction='sum'.
    B2, D2 = 256, 100            # total=25600 -> rows=200 -> grid=2, mask tail
    k3, k4, key = jax.random.split(key, 3)
    y_hat2 = jax.random.normal(k3, (N_CRIT, B2, D2), dtype=jnp.float32)
    y2 = jax.random.normal(k4, (B2, D2), dtype=jnp.float32)
    out2 = jax.block_until_ready(
        multi_objective_loss(y_hat2, y2, weights, reduction="sum",
                             use_pallas=True))
    ref2 = jax.block_until_ready(
        reference_loss(y_hat2, y2, weights, reduction="sum"))
    assert jnp.allclose(out2, ref2, rtol=1e-4, atol=1e-2), (out2, ref2)

    # 3) Lane-pad path (B*D not a multiple of 128), bf16 inputs.
    B3, D3 = 10, 37              # total=370 -> pad 14 lanes in the last row
    k5, k6, key = jax.random.split(key, 3)
    y_hat3 = jax.random.normal(k5, (N_CRIT, B3, D3), dtype=jnp.bfloat16)
    y3 = jax.random.normal(k6, (B3, D3), dtype=jnp.bfloat16)
    out3 = jax.block_until_ready(
        multi_objective_loss(y_hat3, y3, weights, use_pallas=True))
    ref3 = jax.block_until_ready(reference_loss(y_hat3, y3, weights))
    assert jnp.allclose(out3, ref3, rtol=2e-2, atol=2e-2), (out3, ref3)

    print("KERNEL_OK")
</pallas_src>

<mosaic_0001>
module attributes {stable_mosaic.version = 11 : i64} {
  func.func @kernel(%arg0: i32, %arg1: memref<2x2x128xf32, #tpu.memory_space<vmem>>, %arg2: memref<2x128xf32, #tpu.memory_space<vmem>>, %arg3: memref<1x2x128xf32, #tpu.memory_space<vmem>>) attributes {dimension_semantics = [#tpu.dimension_semantics<parallel>], iteration_bounds = array<i64: 1>, scalar_prefetch = 0 : i64, scratch_operands = 0 : i64, tpu.core_type = #tpu.core_type<tc>, window_params = [{transform_indices = @transform_0, window_bounds = array<i64: 2, 2, 128>}, {transform_indices = @transform_1, window_bounds = array<i64: 2, 128>}, {transform_indices = @transform_2, window_bounds = array<i64: 1, 2, 128>}]} {
    %cst = arith.constant 0.000000e+00 : f32
    %0 = vector.broadcast %cst : f32 to vector<1x128xf32>
    %cst_0 = arith.constant 0.000000e+00 : f32
    %1 = vector.broadcast %cst_0 : f32 to vector<1x128xf32>
    %cst_1 = arith.constant 0.000000e+00 : f32
    %2 = vector.broadcast %cst_1 : f32 to vector<2x128xf32>
    %cst_2 = arith.constant 0.000000e+00 : f32
    %3 = vector.broadcast %cst_2 : f32 to vector<2x128xf32>
    %c0_i32 = arith.constant 0 : i32
    %c2_i32 = arith.constant 2 : i32
    %4 = arith.muli %c0_i32, %c2_i32 : i32
    %5 = tpu.assume_multiple %4, 2 : i32
    %6 = arith.index_cast %5 : i32 to index
    %c0 = arith.constant 0 : index
    %7 = vector.load %arg2[%6, %c0] : memref<2x128xf32, #tpu.memory_space<vmem>>, vector<2x128xf32>
    %c0_3 = arith.constant 0 : index
    %8 = arith.index_cast %5 : i32 to index
    %c0_4 = arith.constant 0 : index
    %9 = vector.load %arg1[%c0_3, %8, %c0_4] : memref<2x2x128xf32, #tpu.memory_space<vmem>>, vector<1x2x128xf32>
    %10 = vector.shape_cast %9 : vector<1x2x128xf32> to vector<2x128xf32>
    %11 = arith.subf %10, %7 : vector<2x128xf32>
    %c1 = arith.constant 1 : index
    %12 = arith.index_cast %5 : i32 to index
    %c0_5 = arith.constant 0 : index
    %13 = vector.load %arg1[%c1, %12, %c0_5] : memref<2x2x128xf32, #tpu.memory_space<vmem>>, vector<1x2x128xf32>
    %14 = vector.shape_cast %13 : vector<1x2x128xf32> to vector<2x128xf32>
    %15 = arith.subf %14, %7 : vector<2x128xf32>
    %16 = arith.mulf %11, %11 : vector<2x128xf32>
    %17 = math.absf %15 : vector<2x128xf32>
    %18 = arith.addf %2, %16 : vector<2x128xf32>
    %19 = arith.addf %3, %17 : vector<2x128xf32>
    %c1_i32 = arith.constant 1 : i32
    %cst_6 = arith.constant dense<0.000000e+00> : vector<128xf32>
    %20 = vector.multi_reduction <add>, %18, %cst_6 [0] : vector<2x128xf32> to vector<128xf32>
    %21 = vector.shape_cast %20 : vector<128xf32> to vector<1x128xf32>
    %22 = arith.addf %0, %21 : vector<1x128xf32>
    %cst_7 = arith.constant dense<0.000000e+00> : vector<128xf32>
    %23 = vector.multi_reduction <add>, %19, %cst_7 [0] : vector<2x128xf32> to vector<128xf32>
    %24 = vector.shape_cast %23 : vector<128xf32> to vector<1x128xf32>
    %25 = arith.addf %1, %24 : vector<1x128xf32>
    %c0_8 = arith.constant 0 : index
    %c0_9 = arith.constant 0 : index
    %c0_10 = arith.constant 0 : index
    %26 = vector.load %arg3[%c0_8, %c0_9, %c0_10] : memref<1x2x128xf32, #tpu.memory_space<vmem>>, vector<1x1x128xf32>
    %27 = vector.shape_cast %26 : vector<1x1x128xf32> to vector<1x128xf32>
    %28 = vector.shape_cast %22 : vector<1x128xf32> to vector<1x1x128xf32>
    tpu.vector_store %arg3[%c0_8, %c0_9, %c0_10], %28 {strides = array<i32>} : memref<1x2x128xf32, #tpu.memory_space<vmem>>, vector<1x1x128xf32>,
    %c0_11 = arith.constant 0 : index
    %c1_12 = arith.constant 1 : index
    %c0_13 = arith.constant 0 : index
    %29 = vector.load %arg3[%c0_11, %c1_12, %c0_13] : memref<1x2x128xf32, #tpu.memory_space<vmem>>, vector<1x1x128xf32>
    %30 = vector.shape_cast %29 : vector<1x1x128xf32> to vector<1x128xf32>
    %31 = vector.shape_cast %25 : vector<1x128xf32> to vector<1x1x128xf32>
    tpu.vector_store %arg3[%c0_11, %c1_12, %c0_13], %31 {strides = array<i32>} : memref<1x2x128xf32, #tpu.memory_space<vmem>>, vector<1x1x128xf32>,
    return
  }
  func.func @transform_0(%arg0: i32) -> (i32, i32, i32) {
    %c0_i32 = arith.constant 0 : i32
    %c0_i32_0 = arith.constant 0 : i32
    %c0_i32_1 = arith.constant 0 : i32
    return %c0_i32, %arg0, %c0_i32_0 : i32, i32, i32
  }
  func.func @transform_1(%arg0: i32) -> (i32, i32) {
    %c0_i32 = arith.constant 0 : i32
    %c0_i32_0 = arith.constant 0 : i32
    return %arg0, %c0_i32 : i32, i32
  }
  func.func @transform_2(%arg0: i32) -> (i32, i32, i32) {
    %c0_i32 = arith.constant 0 : i32
    %c0_i32_0 = arith.constant 0 : i32
    %c0_i32_1 = arith.constant 0 : i32
    return %arg0, %c0_i32, %c0_i32_0 : i32, i32, i32
  }
}

</mosaic_0001>

<bundles_post_ra>
// kernel: tpu_custom_call.1
= control target key start
LH: loop header
LB: loop body
LE: loop exit
PB: predicated region body
PF: predicated region fallthrough
CT: control target
= control target key end

     0   :  { %7 = vsyncpa [#allocation3], 0  ;;  %s203_s0 = inlined_call_operand.hbm [shape: f32[2,2,128], index: 0, kind: input, shape index: {}]   ;;  %s204_s1 = inlined_call_operand.hbm [shape: f32[2,128], index: 1, kind: input, shape index: {}]   ;;  %s205_s2 = inlined_call_operand.hbm [shape: f32[1,2,128], index: 2, kind: output, shape index: {}]  }
   0x1   :  { %8 = vsyncpa [#allocation6], 0 }
   0x2   :  { %9 = vsyncpa [#allocation4], 0  ;;  %s14_s11 = sshll.u32 %s203_s0, 4  ;;  %s174_s12 = smov [#allocation2]   ;;  %s15_s11 = int_to_ptr.hbm [resolvable:$true] %s14_s11 }
   0x3   :  { %s16_s13 = sshll.u32 %s174_s12, 4  ;;  %s28_s16 = sshll.u32 %s204_s1, 4  ;;  %s17_s13 = int_to_ptr.vmem [resolvable:$true] %s16_s13  ;;  %s29_s16 = int_to_ptr.hbm [resolvable:$true] %s28_s16 }
   0x4   :  { %s175_s17 = smov 32   ;;  %s176_s18 = smov 2  }
   0x5   :  { %22 = dma.hbm_to_vmem [thread:$0]  %s15_s11, 64, %s17_s13, [#allocation3], %s175_s17, %s175_s17, %s176_s18  }
   0x6   :  { %s177_s19 = smov [#allocation5]  }
   0x7   :  { %s30_s20 = sshll.u32 %s177_s19, 4  ;;  %s31_s20 = int_to_ptr.vmem [resolvable:$true] %s30_s20 }
   0x8   :  { %33 = dma.hbm_to_vmem [thread:$0]  %s29_s16, 32, %s31_s20, [#allocation6]  }
   0x9   :  { %168 = dma.done.wait [#allocation3], 64  }
   0xa   :  { %169 = vsyncadd [#allocation3], 4294967232 }
   0xb   :  { %170 = dma.done.wait [#allocation6], 32  }
   0xc   :  { %171 = vsyncadd [#allocation6], 4294967264  ;;  %v42_v0 = vld [vmem:[#allocation5] sm:$0x3]  ;;  %v43_v1 = vld [vmem:[#allocation2] sm:$0x3] }
   0xd   :  { %v47_v2 = vld [vmem:[#allocation2 + $0x2] sm:$0x3]  ;;  %v44_v3 = vsub.f32 %v43_v1, %v42_v0  ;;  %vm53_vm0 = vcmask 1041408   ;;  %s178_s0 = smov [#allocation7]   ;;  %s79_s23 = sshll.u32 %s205_s2, 4  ;;  %s80_s23 = int_to_ptr.hbm [resolvable:$true] %s79_s23 }
   0xe   :  { %v48_v4 = vsub.f32 %v47_v2, %v42_v0  ;;  %s77_s1 = sshll.u32 %s178_s0, 4  ;;  %s78_s1 = int_to_ptr.vmem [resolvable:$true] %s77_s1 }
   0xf   :  { %v49_v5 = vmul.f32 %v44_v3, %v44_v3 }
  0x10   :  { %v50_v6 = vand.u32 2147483647, %v48_v4 }
  0x11   :  { %v54_v7 = vsel %vm53_vm0, %v49_v5, 0.0 }
  0x12   :  { %v62_v8 = vsel %vm53_vm0, %v50_v6, 0.0  ;;  %v55_v9 = vrot.slane %v54_v7, 4 }
  0x13   :  { %v63_v10 = vrot.slane %v62_v8, 4 }
  0x14   :  { %v56_v11 = vadd.f32 %v55_v9, %v54_v7 }
  0x15   :  { %v64_v12 = vadd.f32 %v63_v10, %v62_v8 }
  0x16   :  { %v57_v13 = vrot.slane %v56_v11, 2 }
  0x17   :  { %v65_v14 = vrot.slane %v64_v12, 2 }
  0x18   :  { %v58_v15 = vadd.f32 %v57_v13, %v56_v11 }
  0x19   :  { %v66_v16 = vadd.f32 %v65_v14, %v64_v12 }
  0x1a   :  { %v59_v17 = vrot.slane %v58_v15, 1 }
  0x1b   :  { %v67_v18 = vrot.slane %v66_v16, 1 }
  0x1c   :  { %v60_v19 = vadd.f32 %v59_v17, %v58_v15 }
  0x1d   :  { %v68_v20 = vadd.f32 %v67_v18, %v66_v16 }
  0x1e   :  { %70 = vst [vmem:[#allocation7] sm:$0x1] %v60_v19 }
  0x1f   :  { %71 = vst [vmem:[#allocation7 + $0x1] sm:$0x1] %v68_v20 }
  0x20   :  { %82 = dma.vmem_to_hbm [thread:$0]  %s78_s1, 32, %s80_s23, [#allocation4]  }
  0x21   :  { %172 = dma.done.wait [#allocation4], 32  }
  0x22   :  { %173 = vsyncadd [#allocation4], 4294967264 }
  0x23   :  { %87 = vsyncpa [#allocation3], 1 }
  0x24   :  { %88 = vsyncpa [#allocation6], 1 }
  0x25   :  { %89 = vsyncpa [#allocation4], 1 }

</bundles_post_ra>
